<compile_context>
chip_gen: v6e
topology: v6e:2x2x1
jax: 0.10.0
libtpu: 0.0.40
codegen_flags: <defaults>
</compile_context>

<pallas_src>
import functools

import numpy as np
import jax
import jax.numpy as jnp
from jax import lax
from jax.experimental import pallas as pl
from jax.experimental.pallas import tpu as pltpu

BN_EPS = 1e-5
MXU_DTYPE = jnp.bfloat16   # MXU operand dtype (perf review); accumulation stays f32


# ----------------------------------------------------------------------------
# Kernel
# ----------------------------------------------------------------------------
def _conv3x3_stacked(pad_ref, h, m_ref, h_in, h_out, lc_in, stride):
    """3x3 'same' conv on a lane-packed row panel.

    Writes zero-padded rows of `h` into the VMEM scratch, reads the three
    vertical taps back as (strided) sublane slices, concatenates them along
    lanes and applies the stacked-K band matrix with a single MXU dot.
    Returns (conv_out_f32, center_tap_f32); the center tap is exactly the
    stride-selected input needed by a 1x1/stride shortcut projection.
    """
    zero_row = jnp.zeros((1, lc_in), jnp.float32)
    pad_ref[pl.ds(0, 1), pl.ds(0, lc_in)] = zero_row          # top zero-pad row
    pad_ref[pl.ds(1, h_in), pl.ds(0, lc_in)] = h
    pad_ref[pl.ds(h_in + 1, 1), pl.ds(0, lc_in)] = zero_row   # bottom zero-pad row

    if stride == 1:
        taps = [pad_ref[pl.ds(ky, h_out), pl.ds(0, lc_in)] for ky in range(3)]
    else:  # strided sublane slices handle the vertical stride (no row-select matmul)
        taps = [pad_ref[pl.ds(ky, h_out, stride=stride), pl.ds(0, lc_in)]
                for ky in range(3)]

    stacked = jnp.concatenate(taps, axis=1).astype(MXU_DTYPE)   # (h_out, 3*lc_in)
    out = jnp.dot(stacked, m_ref[...], preferred_element_type=jnp.float32)
    return out, taps[1]


def _network_block_kernel(meta, *refs):
    """Fused NetworkBlock: every BasicBlock runs inside this one kernel; the
    activation panel never leaves VMEM between layers."""
    x_ref, o_ref, pad_ref = refs[0], refs[-2], refs[-1]
    a = x_ref[0]                                   # (H, pack*W*Cin) f32 panel
    idx = 1
    for (stride, h_in, h_out, lc_in, lc_out, has_proj) in meta:
        s1, b1, s2, b2, m1, m2 = refs[idx:idx + 6]
        idx += 6
        msc = None
        if has_proj:
            msc = refs[idx]
            idx += 1

        h = jnp.maximum(a * s1[...] + b1[...], 0.0)            # relu(bn1(x)), f32 VPU
        y, center = _conv3x3_stacked(pad_ref, h, m1, h_in, h_out, lc_in, stride)
        z = jnp.maximum(y * s2[...] + b2[...], 0.0)            # relu(bn2(.)), f32 VPU
        # TODO(synk): dropout skipped (dropRate=0.0 / eval mode -> identity).

        if has_proj:                                           # 1x1/stride projection of h
            res = jnp.dot(center.astype(MXU_DTYPE), msc[...],
                          preferred_element_type=jnp.float32)
        else:                                                  # identity shortcut
            res = a

        out, _ = _conv3x3_stacked(pad_ref, z, m2, h_out, h_out, lc_out, 1)
        a = out + res
    o_ref[0] = a.astype(o_ref.dtype)


# ----------------------------------------------------------------------------
# Host-side (NumPy) one-time precompute of all constant kernel inputs
# ----------------------------------------------------------------------------
def fold_bn_np(bn):
    gamma, beta, mean, var = (np.asarray(t, np.float32) for t in bn)
    scale = gamma / np.sqrt(var + BN_EPS)
    return scale, beta - mean * scale


def _band_mat_3x3_np(w, w_in, w_out, stride, pack):
    """Stacked-K, sample-block-diagonal band matrix for a 3x3 'same' conv:
    shape (3*pack*w_in*cin, pack*w_out*cout). Row block ky is the band matrix
    of vertical tap ky (horizontal taps + horizontal stride + zero pad folded
    in), so one dot applies all nine taps."""
    kh, kw, cin, cout = w.shape
    base = np.zeros((kh, w_in * cin, w_out * cout), np.float32)
    for ky in range(kh):
        for kx in range(kw):
            for jo in range(w_out):
                jin = stride * jo + kx - 1
                if 0 <= jin < w_in:
                    base[ky, jin * cin:(jin + 1) * cin,
                         jo * cout:(jo + 1) * cout] = w[ky, kx]
    lane_in, lane_out = pack * w_in * cin, pack * w_out * cout
    mat = np.zeros((kh, lane_in, lane_out), np.float32)
    for p in range(pack):
        mat[:, p * w_in * cin:(p + 1) * w_in * cin,
            p * w_out * cout:(p + 1) * w_out * cout] = base
    return mat.reshape(kh * lane_in, lane_out)


def _band_mat_1x1_np(w, w_in, w_out, stride, pack):
    """1x1/stride conv as a sample-block-diagonal band matrix
    (pack*w_in*cin, pack*w_out*cout). Applied to the center vertical tap."""
    cin, cout = w.shape[2], w.shape[3]
    base = np.zeros((w_in * cin, w_out * cout), np.float32)
    for jo in range(w_out):
        jin = stride * jo
        base[jin * cin:(jin + 1) * cin, jo * cout:(jo + 1) * cout] = w[0, 0]
    lane_in, lane_out = pack * w_in * cin, pack * w_out * cout
    mat = np.zeros((lane_in, lane_out), np.float32)
    for p in range(pack):
        mat[p * w_in * cin:(p + 1) * w_in * cin,
            p * w_out * cout:(p + 1) * w_out * cout] = base
    return mat


def prepare_network_block(layers, H, W, N):
    """One-time host precompute: folded BN rows + band matrices (bf16) + static
    per-layer metadata. Nothing here runs inside the traced forward."""
    pack = 2 if N % 2 == 0 else 1      # 2 samples / lane group -> 128-wide lanes here
    arrays, meta = [], []
    h, w = H, W
    scr_rows = scr_cols = flops = 0
    cf = None
    for layer in layers:
        p, stride, equal = layer["params"], layer["stride"], layer["equal"]
        w1 = np.asarray(p["w1"], np.float32)
        w2 = np.asarray(p["w2"], np.float32)
        cin, cout = w1.shape[2], w1.shape[3]
        h_out, w_out = (h - 1) // stride + 1, (w - 1) // stride + 1
        lc_in, lc_out = pack * w * cin, pack * w_out * cout
        if equal:
            assert stride == 1 and cin == cout, "identity shortcut needs same shape"

        s1, b1 = fold_bn_np(p["bn1"])
        s2, b2 = fold_bn_np(p["bn2"])
        layer_arrays = [
            (np.tile(s1, pack * w).reshape(1, lc_in), jnp.float32),
            (np.tile(b1, pack * w).reshape(1, lc_in), jnp.float32),
            (np.tile(s2, pack * w_out).reshape(1, lc_out), jnp.float32),
            (np.tile(b2, pack * w_out).reshape(1, lc_out), jnp.float32),
            (_band_mat_3x3_np(w1, w, w_out, stride, pack), MXU_DTYPE),
            (_band_mat_3x3_np(w2, w_out, w_out, 1, pack), MXU_DTYPE),
        ]
        flops += 2 * h_out * (3 * lc_in) * lc_out          # conv1 stacked-K dot
        flops += 2 * h_out * (3 * lc_out) * lc_out         # conv2 stacked-K dot
        if not equal:
            layer_arrays.append(
                (_band_mat_1x1_np(np.asarray(p["wsc"], np.float32),
                                  w, w_out, stride, pack), MXU_DTYPE))
            flops += 2 * h_out * lc_in * lc_out
        arrays += [jnp.asarray(a, d) for a, d in layer_arrays]
        meta.append((stride, h, h_out, lc_in, lc_out, not equal))
        scr_rows = max(scr_rows, h + 2)
        scr_cols = max(scr_cols, lc_in, lc_out)
        h, w, cf = h_out, w_out, cout

    return dict(arrays=arrays, meta=tuple(meta), pack=pack,
                Hf=h, Wf=w, Cf=cf,
                scratch_rows=scr_rows, scratch_cols=scr_cols,
                flops_per_step=flops)


# ----------------------------------------------------------------------------
# NetworkBlock forward: one pallas_call for the whole block
# ----------------------------------------------------------------------------
def network_block_forward(x_nchw, prep):
    pack, meta = prep["pack"], prep["meta"]
    N, C, H, W = x_nchw.shape
    assert N % pack == 0
    NP = N // pack
    lc0 = pack * W * C
    Hf, Wf, Cf = prep["Hf"], prep["Wf"], prep["Cf"]
    lcf = pack * Wf * Cf

    # NCHW -> lane-packed row panels (NP, H, pack*W*C); lane = p*(W*C) + x*C + c
    xp = jnp.transpose(x_nchw, (0, 2, 3, 1)).reshape(NP, pack, H, W * C)
    xp = jnp.transpose(xp, (0, 2, 1, 3)).reshape(NP, H, lc0)

    args = [xp] + list(prep["arrays"])
    in_specs = [pl.BlockSpec((1, H, lc0), lambda n: (n, 0, 0))]
    in_specs += [pl.BlockSpec(a.shape, lambda n: (0, 0)) for a in prep["arrays"]]
    out_spec = pl.BlockSpec((1, Hf, lcf), lambda n: (n, 0, 0))

    # VMEM budget from actual buffer sizes (double-buffered blocks) + margin.
    const_bytes = sum(int(np.prod(a.shape)) * a.dtype.itemsize for a in prep["arrays"])
    block_bytes = H * lc0 * 4 + Hf * lcf * 4 + const_bytes
    scratch_bytes = prep["scratch_rows"] * prep["scratch_cols"] * 4
    vmem_limit = int(min(2 * block_bytes + scratch_bytes + (8 << 20), 64 << 20))

    cost = pl.CostEstimate(
        flops=int(NP * prep["flops_per_step"]), transcendentals=0,
        bytes_accessed=int(N * (H * W * C + Hf * Wf * Cf) * 4 + const_bytes))

    out = pl.pallas_call(
        functools.partial(_network_block_kernel, meta),
        out_shape=jax.ShapeDtypeStruct((NP, Hf, lcf), jnp.float32),
        grid=(NP,),
        in_specs=in_specs,
        out_specs=out_spec,
        scratch_shapes=[pltpu.VMEM((prep["scratch_rows"], prep["scratch_cols"]),
                                   jnp.float32)],
        compiler_params=pltpu.CompilerParams(
            dimension_semantics=("parallel",),
            vmem_limit_bytes=vmem_limit),
        cost_estimate=cost,
    )(*args)

    # (NP, Hf, pack*Wf*Cf) -> NCHW
    out = out.reshape(NP, Hf, pack, Wf, Cf)
    return jnp.transpose(out, (0, 2, 4, 1, 3)).reshape(N, Cf, Hf, Wf)


# ----------------------------------------------------------------------------
# Parameter init (matches WRN BasicBlock structure, eval-mode BN stats)
# ----------------------------------------------------------------------------
def init_bn(keys, c):
    gamma = 1.0 + 0.1 * jax.random.normal(keys[0], (c,), jnp.float32)
    beta = 0.1 * jax.random.normal(keys[1], (c,), jnp.float32)
    mean = 0.1 * jax.random.normal(keys[2], (c,), jnp.float32)
    var = 0.9 + 0.2 * jax.random.uniform(keys[3], (c,), jnp.float32)
    return (gamma, beta, mean, var)


def init_network_block(key, nb_layers, in_planes, out_planes, stride):
    layers = []
    for i in range(nb_layers):
        cin = in_planes if i == 0 else out_planes
        s = stride if i == 0 else 1
        key, *ks = jax.random.split(key, 12)
        n = 3 * 3 * out_planes  # WRN kaiming init: std = sqrt(2/n)
        w1 = jax.random.normal(ks[0], (3, 3, cin, out_planes), jnp.float32) * np.sqrt(2.0 / n)
        w2 = jax.random.normal(ks[1], (3, 3, out_planes, out_planes), jnp.float32) * np.sqrt(2.0 / n)
        params = dict(w1=w1, w2=w2,
                      bn1=init_bn(ks[2:6], cin),
                      bn2=init_bn(ks[6:10], out_planes))
        equal = (cin == out_planes)
        if not equal:
            params["wsc"] = (jax.random.normal(ks[10], (1, 1, cin, out_planes), jnp.float32)
                             * np.sqrt(2.0 / out_planes))
        layers.append(dict(params=params, stride=s, equal=equal))
    return layers


# ----------------------------------------------------------------------------
# Pure-JAX reference (lax.conv, fp32 HIGHEST) for correctness checking
# ----------------------------------------------------------------------------
def _fold_bn(bn):
    gamma, beta, mean, var = bn
    scale = gamma / jnp.sqrt(var + BN_EPS)
    return scale, beta - mean * scale


def _ref_basic_block(x, layer):
    p, stride, equal = layer["params"], layer["stride"], layer["equal"]
    dn = ("NHWC", "HWIO", "NHWC")
    s1, b1 = _fold_bn(p["bn1"])
    h = jnp.maximum(x * s1 + b1, 0.0)
    y = lax.conv_general_dilated(h, p["w1"], (stride, stride), ((1, 1), (1, 1)),
                                 dimension_numbers=dn, precision=lax.Precision.HIGHEST)
    s2, b2 = _fold_bn(p["bn2"])
    z = jnp.maximum(y * s2 + b2, 0.0)
    y2 = lax.conv_general_dilated(z, p["w2"], (1, 1), ((1, 1), (1, 1)),
                                  dimension_numbers=dn, precision=lax.Precision.HIGHEST)
    if equal:
        res = x
    else:
        res = lax.conv_general_dilated(h, p["wsc"], (stride, stride), ((0, 0), (0, 0)),
                                       dimension_numbers=dn, precision=lax.Precision.HIGHEST)
    return res + y2


def _ref_network_block(x_nchw, layers):
    x = jnp.transpose(x_nchw, (0, 2, 3, 1))
    for layer in layers:
        x = _ref_basic_block(x, layer)
    return jnp.transpose(x, (0, 3, 1, 2))


# ----------------------------------------------------------------------------
if __name__ == "__main__":
    # NetworkBlock(nb_layers=2, in_planes=4, out_planes=8, block=BasicBlock,
    #              stride=2, dropRate=0.0)
    nb_layers, in_planes, out_planes, stride = 2, 4, 8, 2

    key = jax.random.PRNGKey(0)
    kx, kp = jax.random.split(key)
    x = jax.random.normal(kx, (2, in_planes, 16, 16), jnp.float32)  # NCHW input
    layers = init_network_block(kp, nb_layers, in_planes, out_planes, stride)

    prep = prepare_network_block(layers, H=16, W=16, N=x.shape[0])  # one-time host precompute
    fwd = jax.jit(lambda xx: network_block_forward(xx, prep))
    out = jax.block_until_ready(fwd(x))

    ref = jax.block_until_ready(_ref_network_block(x, layers))
    assert out.shape == (2, out_planes, 8, 8), out.shape
    # bf16 MXU operands (per perf review) vs fp32 lax.conv reference ->
    # re-baselined tolerance (estimated max abs error ~1e-2 at these scales).
    np.testing.assert_allclose(np.asarray(out), np.asarray(ref),
                               rtol=3e-2, atol=6e-2)
    print("KERNEL_OK")
</pallas_src>

<mosaic_0001>
module attributes {stable_mosaic.version = 11 : i64} {
  func.func @_network_block_kernel(%arg0: i32, %arg1: memref<1x16x128xf32, #tpu.memory_space<vmem>>, %arg2: memref<1x128xf32, #tpu.memory_space<vmem>>, %arg3: memref<1x128xf32, #tpu.memory_space<vmem>>, %arg4: memref<1x128xf32, #tpu.memory_space<vmem>>, %arg5: memref<1x128xf32, #tpu.memory_space<vmem>>, %arg6: memref<384x128xbf16, #tpu.memory_space<vmem>>, %arg7: memref<384x128xbf16, #tpu.memory_space<vmem>>, %arg8: memref<128x128xbf16, #tpu.memory_space<vmem>>, %arg9: memref<1x128xf32, #tpu.memory_space<vmem>>, %arg10: memref<1x128xf32, #tpu.memory_space<vmem>>, %arg11: memref<1x128xf32, #tpu.memory_space<vmem>>, %arg12: memref<1x128xf32, #tpu.memory_space<vmem>>, %arg13: memref<384x128xbf16, #tpu.memory_space<vmem>>, %arg14: memref<384x128xbf16, #tpu.memory_space<vmem>>, %arg15: memref<1x8x128xf32, #tpu.memory_space<vmem>>, %arg16: memref<18x128xf32, #tpu.memory_space<vmem>>) attributes {dimension_semantics = [#tpu.dimension_semantics<parallel>], iteration_bounds = array<i64: 1>, scalar_prefetch = 0 : i64, scratch_operands = 1 : i64, tpu.core_type = #tpu.core_type<tc>, window_params = [{transform_indices = @transform_0, window_bounds = array<i64: 1, 16, 128>}, {pipeline_mode = #tpu.pipeline_mode<synchronous>, transform_indices = @transform_1, window_bounds = array<i64: 1, 128>}, {pipeline_mode = #tpu.pipeline_mode<synchronous>, transform_indices = @transform_2, window_bounds = array<i64: 1, 128>}, {pipeline_mode = #tpu.pipeline_mode<synchronous>, transform_indices = @transform_3, window_bounds = array<i64: 1, 128>}, {pipeline_mode = #tpu.pipeline_mode<synchronous>, transform_indices = @transform_4, window_bounds = array<i64: 1, 128>}, {pipeline_mode = #tpu.pipeline_mode<synchronous>, transform_indices = @transform_5, window_bounds = array<i64: 384, 128>}, {pipeline_mode = #tpu.pipeline_mode<synchronous>, transform_indices = @transform_6, window_bounds = array<i64: 384, 128>}, {pipeline_mode = #tpu.pipeline_mode<synchronous>, transform_indices = @transform_7, window_bounds = array<i64: 128, 128>}, {pipeline_mode = #tpu.pipeline_mode<synchronous>, transform_indices = @transform_8, window_bounds = array<i64: 1, 128>}, {pipeline_mode = #tpu.pipeline_mode<synchronous>, transform_indices = @transform_9, window_bounds = array<i64: 1, 128>}, {pipeline_mode = #tpu.pipeline_mode<synchronous>, transform_indices = @transform_10, window_bounds = array<i64: 1, 128>}, {pipeline_mode = #tpu.pipeline_mode<synchronous>, transform_indices = @transform_11, window_bounds = array<i64: 1, 128>}, {pipeline_mode = #tpu.pipeline_mode<synchronous>, transform_indices = @transform_12, window_bounds = array<i64: 384, 128>}, {pipeline_mode = #tpu.pipeline_mode<synchronous>, transform_indices = @transform_13, window_bounds = array<i64: 384, 128>}, {transform_indices = @transform_14, window_bounds = array<i64: 1, 8, 128>}]} {
    %c0 = arith.constant 0 : index
    %c0_0 = arith.constant 0 : index
    %c0_1 = arith.constant 0 : index
    %0 = vector.load %arg1[%c0, %c0_0, %c0_1] : memref<1x16x128xf32, #tpu.memory_space<vmem>>, vector<1x16x128xf32>
    %1 = vector.shape_cast %0 : vector<1x16x128xf32> to vector<16x128xf32>
    %c0_2 = arith.constant 0 : index
    %c0_3 = arith.constant 0 : index
    %2 = vector.load %arg2[%c0_2, %c0_3] : memref<1x128xf32, #tpu.memory_space<vmem>>, vector<1x128xf32>
    %3 = vector.broadcast %2 : vector<1x128xf32> to vector<16x128xf32>
    %4 = arith.mulf %1, %3 : vector<16x128xf32>
    %c0_4 = arith.constant 0 : index
    %c0_5 = arith.constant 0 : index
    %5 = vector.load %arg3[%c0_4, %c0_5] : memref<1x128xf32, #tpu.memory_space<vmem>>, vector<1x128xf32>
    %6 = vector.broadcast %5 : vector<1x128xf32> to vector<16x128xf32>
    %7 = arith.addf %4, %6 : vector<16x128xf32>
    %cst = arith.constant 0.000000e+00 : f32
    %8 = vector.broadcast %cst : f32 to vector<16x128xf32>
    %9 = arith.maximumf %7, %8 : vector<16x128xf32>
    %cst_6 = arith.constant 0.000000e+00 : f32
    %10 = vector.broadcast %cst_6 : f32 to vector<1x128xf32>
    %c0_7 = arith.constant 0 : index
    %c0_8 = arith.constant 0 : index
    %11 = vector.load %arg16[%c0_7, %c0_8] : memref<18x128xf32, #tpu.memory_space<vmem>>, vector<1x128xf32>
    tpu.vector_store %arg16[%c0_7, %c0_8], %10 {strides = array<i32>} : memref<18x128xf32, #tpu.memory_space<vmem>>, vector<1x128xf32>,
    %c1 = arith.constant 1 : index
    %c0_9 = arith.constant 0 : index
    %12 = vector.load %arg16[%c1, %c0_9] : memref<18x128xf32, #tpu.memory_space<vmem>>, vector<16x128xf32>
    tpu.vector_store %arg16[%c1, %c0_9], %9 {strides = array<i32>} : memref<18x128xf32, #tpu.memory_space<vmem>>, vector<16x128xf32>,
    %c17 = arith.constant 17 : index
    %c0_10 = arith.constant 0 : index
    %13 = vector.load %arg16[%c17, %c0_10] : memref<18x128xf32, #tpu.memory_space<vmem>>, vector<1x128xf32>
    tpu.vector_store %arg16[%c17, %c0_10], %10 {strides = array<i32>} : memref<18x128xf32, #tpu.memory_space<vmem>>, vector<1x128xf32>,
    %c0_11 = arith.constant 0 : index
    %c0_12 = arith.constant 0 : index
    %14 = tpu.strided_load %arg16[%c0_11, %c0_12] {strides = array<i32: 2, 1>} : memref<18x128xf32, #tpu.memory_space<vmem>>, vector<8x128xf32>
    %c1_13 = arith.constant 1 : index
    %c0_14 = arith.constant 0 : index
    %15 = tpu.strided_load %arg16[%c1_13, %c0_14] {strides = array<i32: 2, 1>} : memref<18x128xf32, #tpu.memory_space<vmem>>, vector<8x128xf32>
    %c2 = arith.constant 2 : index
    %c0_15 = arith.constant 0 : index
    %16 = tpu.strided_load %arg16[%c2, %c0_15] {strides = array<i32: 2, 1>} : memref<18x128xf32, #tpu.memory_space<vmem>>, vector<8x128xf32>
    %17 = tpu.concatenate %14, %15, %16 in 1 : vector<8x128xf32>, vector<8x128xf32>, vector<8x128xf32> -> vector<8x384xf32>
    %18 = arith.truncf %17 : vector<8x384xf32> to vector<8x384xbf16>
    %c0_16 = arith.constant 0 : index
    %c0_17 = arith.constant 0 : index
    %19 = vector.load %arg6[%c0_16, %c0_17] : memref<384x128xbf16, #tpu.memory_space<vmem>>, vector<384x128xbf16>
    %cst_18 = arith.constant dense<0.000000e+00> : vector<8x128xf32>
    %20 = tpu.matmul %18, %19, %cst_18 {dimension_numbers = #tpu.dot_dimension_numbers<[1], [0], [0], [1], [0, 0, 1, 1], [], []>} : vector<8x384xbf16>, vector<384x128xbf16>, vector<8x128xf32> -> vector<8x128xf32>
    %c0_19 = arith.constant 0 : index
    %c0_20 = arith.constant 0 : index
    %21 = vector.load %arg4[%c0_19, %c0_20] : memref<1x128xf32, #tpu.memory_space<vmem>>, vector<1x128xf32>
    %22 = vector.broadcast %21 : vector<1x128xf32> to vector<8x128xf32>
    %23 = arith.mulf %20, %22 : vector<8x128xf32>
    %c0_21 = arith.constant 0 : index
    %c0_22 = arith.constant 0 : index
    %24 = vector.load %arg5[%c0_21, %c0_22] : memref<1x128xf32, #tpu.memory_space<vmem>>, vector<1x128xf32>
    %25 = vector.broadcast %24 : vector<1x128xf32> to vector<8x128xf32>
    %26 = arith.addf %23, %25 : vector<8x128xf32>
    %cst_23 = arith.constant 0.000000e+00 : f32
    %27 = vector.broadcast %cst_23 : f32 to vector<8x128xf32>
    %28 = arith.maximumf %26, %27 : vector<8x128xf32>
    %29 = arith.truncf %15 : vector<8x128xf32> to vector<8x128xbf16>
    %c0_24 = arith.constant 0 : index
    %c0_25 = arith.constant 0 : index
    %30 = vector.load %arg8[%c0_24, %c0_25] : memref<128x128xbf16, #tpu.memory_space<vmem>>, vector<128x128xbf16>
    %cst_26 = arith.constant dense<0.000000e+00> : vector<8x128xf32>
    %31 = tpu.matmul %29, %30, %cst_26 {dimension_numbers = #tpu.dot_dimension_numbers<[1], [0], [0], [1], [0, 0, 1, 1], [], []>} : vector<8x128xbf16>, vector<128x128xbf16>, vector<8x128xf32> -> vector<8x128xf32>
    %cst_27 = arith.constant 0.000000e+00 : f32
    %32 = vector.broadcast %cst_27 : f32 to vector<1x128xf32>
    %c0_28 = arith.constant 0 : index
    %c0_29 = arith.constant 0 : index
    %33 = vector.load %arg16[%c0_28, %c0_29] : memref<18x128xf32, #tpu.memory_space<vmem>>, vector<1x128xf32>
    tpu.vector_store %arg16[%c0_28, %c0_29], %32 {strides = array<i32>} : memref<18x128xf32, #tpu.memory_space<vmem>>, vector<1x128xf32>,
    %c1_30 = arith.constant 1 : index
    %c0_31 = arith.constant 0 : index
    %34 = vector.load %arg16[%c1_30, %c0_31] : memref<18x128xf32, #tpu.memory_space<vmem>>, vector<8x128xf32>
    tpu.vector_store %arg16[%c1_30, %c0_31], %28 {strides = array<i32>} : memref<18x128xf32, #tpu.memory_space<vmem>>, vector<8x128xf32>,
    %c9 = arith.constant 9 : index
    %c0_32 = arith.constant 0 : index
    %35 = vector.load %arg16[%c9, %c0_32] : memref<18x128xf32, #tpu.memory_space<vmem>>, vector<1x128xf32>
    tpu.vector_store %arg16[%c9, %c0_32], %32 {strides = array<i32>} : memref<18x128xf32, #tpu.memory_space<vmem>>, vector<1x128xf32>,
    %c0_33 = arith.constant 0 : index
    %c0_34 = arith.constant 0 : index
    %36 = vector.load %arg16[%c0_33, %c0_34] : memref<18x128xf32, #tpu.memory_space<vmem>>, vector<8x128xf32>
    %c1_35 = arith.constant 1 : index
    %c0_36 = arith.constant 0 : index
    %37 = vector.load %arg16[%c1_35, %c0_36] : memref<18x128xf32, #tpu.memory_space<vmem>>, vector<8x128xf32>
    %c2_37 = arith.constant 2 : index
    %c0_38 = arith.constant 0 : index
    %38 = vector.load %arg16[%c2_37, %c0_38] : memref<18x128xf32, #tpu.memory_space<vmem>>, vector<8x128xf32>
    %39 = tpu.concatenate %36, %37, %38 in 1 : vector<8x128xf32>, vector<8x128xf32>, vector<8x128xf32> -> vector<8x384xf32>
    %40 = arith.truncf %39 : vector<8x384xf32> to vector<8x384xbf16>
    %c0_39 = arith.constant 0 : index
    %c0_40 = arith.constant 0 : index
    %41 = vector.load %arg7[%c0_39, %c0_40] : memref<384x128xbf16, #tpu.memory_space<vmem>>, vector<384x128xbf16>
    %cst_41 = arith.constant dense<0.000000e+00> : vector<8x128xf32>
    %42 = tpu.matmul %40, %41, %cst_41 {dimension_numbers = #tpu.dot_dimension_numbers<[1], [0], [0], [1], [0, 0, 1, 1], [], []>} : vector<8x384xbf16>, vector<384x128xbf16>, vector<8x128xf32> -> vector<8x128xf32>
    %43 = arith.addf %42, %31 : vector<8x128xf32>
    %c0_42 = arith.constant 0 : index
    %c0_43 = arith.constant 0 : index
    %44 = vector.load %arg9[%c0_42, %c0_43] : memref<1x128xf32, #tpu.memory_space<vmem>>, vector<1x128xf32>
    %45 = vector.broadcast %44 : vector<1x128xf32> to vector<8x128xf32>
    %46 = arith.mulf %43, %45 : vector<8x128xf32>
    %c0_44 = arith.constant 0 : index
    %c0_45 = arith.constant 0 : index
    %47 = vector.load %arg10[%c0_44, %c0_45] : memref<1x128xf32, #tpu.memory_space<vmem>>, vector<1x128xf32>
    %48 = vector.broadcast %47 : vector<1x128xf32> to vector<8x128xf32>
    %49 = arith.addf %46, %48 : vector<8x128xf32>
    %cst_46 = arith.constant 0.000000e+00 : f32
    %50 = vector.broadcast %cst_46 : f32 to vector<8x128xf32>
    %51 = arith.maximumf %49, %50 : vector<8x128xf32>
    %cst_47 = arith.constant 0.000000e+00 : f32
    %52 = vector.broadcast %cst_47 : f32 to vector<1x128xf32>
    %c0_48 = arith.constant 0 : index
    %c0_49 = arith.constant 0 : index
    %53 = vector.load %arg16[%c0_48, %c0_49] : memref<18x128xf32, #tpu.memory_space<vmem>>, vector<1x128xf32>
    tpu.vector_store %arg16[%c0_48, %c0_49], %52 {strides = array<i32>} : memref<18x128xf32, #tpu.memory_space<vmem>>, vector<1x128xf32>,
    %c1_50 = arith.constant 1 : index
    %c0_51 = arith.constant 0 : index
    %54 = vector.load %arg16[%c1_50, %c0_51] : memref<18x128xf32, #tpu.memory_space<vmem>>, vector<8x128xf32>
    tpu.vector_store %arg16[%c1_50, %c0_51], %51 {strides = array<i32>} : memref<18x128xf32, #tpu.memory_space<vmem>>, vector<8x128xf32>,
    %c9_52 = arith.constant 9 : index
    %c0_53 = arith.constant 0 : index
    %55 = vector.load %arg16[%c9_52, %c0_53] : memref<18x128xf32, #tpu.memory_space<vmem>>, vector<1x128xf32>
    tpu.vector_store %arg16[%c9_52, %c0_53], %52 {strides = array<i32>} : memref<18x128xf32, #tpu.memory_space<vmem>>, vector<1x128xf32>,
    %c0_54 = arith.constant 0 : index
    %c0_55 = arith.constant 0 : index
    %56 = vector.load %arg16[%c0_54, %c0_55] : memref<18x128xf32, #tpu.memory_space<vmem>>, vector<8x128xf32>
    %c1_56 = arith.constant 1 : index
    %c0_57 = arith.constant 0 : index
    %57 = vector.load %arg16[%c1_56, %c0_57] : memref<18x128xf32, #tpu.memory_space<vmem>>, vector<8x128xf32>
    %c2_58 = arith.constant 2 : index
    %c0_59 = arith.constant 0 : index
    %58 = vector.load %arg16[%c2_58, %c0_59] : memref<18x128xf32, #tpu.memory_space<vmem>>, vector<8x128xf32>
    %59 = tpu.concatenate %56, %57, %58 in 1 : vector<8x128xf32>, vector<8x128xf32>, vector<8x128xf32> -> vector<8x384xf32>
    %60 = arith.truncf %59 : vector<8x384xf32> to vector<8x384xbf16>
    %c0_60 = arith.constant 0 : index
    %c0_61 = arith.constant 0 : index
    %61 = vector.load %arg13[%c0_60, %c0_61] : memref<384x128xbf16, #tpu.memory_space<vmem>>, vector<384x128xbf16>
    %cst_62 = arith.constant dense<0.000000e+00> : vector<8x128xf32>
    %62 = tpu.matmul %60, %61, %cst_62 {dimension_numbers = #tpu.dot_dimension_numbers<[1], [0], [0], [1], [0, 0, 1, 1], [], []>} : vector<8x384xbf16>, vector<384x128xbf16>, vector<8x128xf32> -> vector<8x128xf32>
    %c0_63 = arith.constant 0 : index
    %c0_64 = arith.constant 0 : index
    %63 = vector.load %arg11[%c0_63, %c0_64] : memref<1x128xf32, #tpu.memory_space<vmem>>, vector<1x128xf32>
    %64 = vector.broadcast %63 : vector<1x128xf32> to vector<8x128xf32>
    %65 = arith.mulf %62, %64 : vector<8x128xf32>
    %c0_65 = arith.constant 0 : index
    %c0_66 = arith.constant 0 : index
    %66 = vector.load %arg12[%c0_65, %c0_66] : memref<1x128xf32, #tpu.memory_space<vmem>>, vector<1x128xf32>
    %67 = vector.broadcast %66 : vector<1x128xf32> to vector<8x128xf32>
    %68 = arith.addf %65, %67 : vector<8x128xf32>
    %cst_67 = arith.constant 0.000000e+00 : f32
    %69 = vector.broadcast %cst_67 : f32 to vector<8x128xf32>
    %70 = arith.maximumf %68, %69 : vector<8x128xf32>
    %cst_68 = arith.constant 0.000000e+00 : f32
    %71 = vector.broadcast %cst_68 : f32 to vector<1x128xf32>
    %c0_69 = arith.constant 0 : index
    %c0_70 = arith.constant 0 : index
    %72 = vector.load %arg16[%c0_69, %c0_70] : memref<18x128xf32, #tpu.memory_space<vmem>>, vector<1x128xf32>
    tpu.vector_store %arg16[%c0_69, %c0_70], %71 {strides = array<i32>} : memref<18x128xf32, #tpu.memory_space<vmem>>, vector<1x128xf32>,
    %c1_71 = arith.constant 1 : index
    %c0_72 = arith.constant 0 : index
    %73 = vector.load %arg16[%c1_71, %c0_72] : memref<18x128xf32, #tpu.memory_space<vmem>>, vector<8x128xf32>
    tpu.vector_store %arg16[%c1_71, %c0_72], %70 {strides = array<i32>} : memref<18x128xf32, #tpu.memory_space<vmem>>, vector<8x128xf32>,
    %c9_73 = arith.constant 9 : index
    %c0_74 = arith.constant 0 : index
    %74 = vector.load %arg16[%c9_73, %c0_74] : memref<18x128xf32, #tpu.memory_space<vmem>>, vector<1x128xf32>
    tpu.vector_store %arg16[%c9_73, %c0_74], %71 {strides = array<i32>} : memref<18x128xf32, #tpu.memory_space<vmem>>, vector<1x128xf32>,
    %c0_75 = arith.constant 0 : index
    %c0_76 = arith.constant 0 : index
    %75 = vector.load %arg16[%c0_75, %c0_76] : memref<18x128xf32, #tpu.memory_space<vmem>>, vector<8x128xf32>
    %c1_77 = arith.constant 1 : index
    %c0_78 = arith.constant 0 : index
    %76 = vector.load %arg16[%c1_77, %c0_78] : memref<18x128xf32, #tpu.memory_space<vmem>>, vector<8x128xf32>
    %c2_79 = arith.constant 2 : index
    %c0_80 = arith.constant 0 : index
    %77 = vector.load %arg16[%c2_79, %c0_80] : memref<18x128xf32, #tpu.memory_space<vmem>>, vector<8x128xf32>
    %78 = tpu.concatenate %75, %76, %77 in 1 : vector<8x128xf32>, vector<8x128xf32>, vector<8x128xf32> -> vector<8x384xf32>
    %79 = arith.truncf %78 : vector<8x384xf32> to vector<8x384xbf16>
    %c0_81 = arith.constant 0 : index
    %c0_82 = arith.constant 0 : index
    %80 = vector.load %arg14[%c0_81, %c0_82] : memref<384x128xbf16, #tpu.memory_space<vmem>>, vector<384x128xbf16>
    %cst_83 = arith.constant dense<0.000000e+00> : vector<8x128xf32>
    %81 = tpu.matmul %79, %80, %cst_83 {dimension_numbers = #tpu.dot_dimension_numbers<[1], [0], [0], [1], [0, 0, 1, 1], [], []>} : vector<8x384xbf16>, vector<384x128xbf16>, vector<8x128xf32> -> vector<8x128xf32>
    %82 = arith.addf %81, %43 : vector<8x128xf32>
    %c0_84 = arith.constant 0 : index
    %c0_85 = arith.constant 0 : index
    %c0_86 = arith.constant 0 : index
    %83 = vector.load %arg15[%c0_84, %c0_85, %c0_86] : memref<1x8x128xf32, #tpu.memory_space<vmem>>, vector<1x8x128xf32>
    %84 = vector.shape_cast %83 : vector<1x8x128xf32> to vector<8x128xf32>
    %85 = vector.shape_cast %82 : vector<8x128xf32> to vector<1x8x128xf32>
    tpu.vector_store %arg15[%c0_84, %c0_85, %c0_86], %85 {strides = array<i32>} : memref<1x8x128xf32, #tpu.memory_space<vmem>>, vector<1x8x128xf32>,
    return
  }
  func.func @transform_0(%arg0: i32) -> (i32, i32, i32) {
    %c0_i32 = arith.constant 0 : i32
    %c0_i32_0 = arith.constant 0 : i32
    %c0_i32_1 = arith.constant 0 : i32
    return %arg0, %c0_i32, %c0_i32_0 : i32, i32, i32
  }
  func.func @transform_1(%arg0: i32) -> (i32, i32) {
    %c0_i32 = arith.constant 0 : i32
    %c0_i32_0 = arith.constant 0 : i32
    %c0_i32_1 = arith.constant 0 : i32
    return %c0_i32, %c0_i32_0 : i32, i32
  }
  func.func @transform_2(%arg0: i32) -> (i32, i32) {
    %c0_i32 = arith.constant 0 : i32
    %c0_i32_0 = arith.constant 0 : i32
    %c0_i32_1 = arith.constant 0 : i32
    return %c0_i32, %c0_i32_0 : i32, i32
  }
  func.func @transform_3(%arg0: i32) -> (i32, i32) {
    %c0_i32 = arith.constant 0 : i32
    %c0_i32_0 = arith.constant 0 : i32
    %c0_i32_1 = arith.constant 0 : i32
    return %c0_i32, %c0_i32_0 : i32, i32
  }
  func.func @transform_4(%arg0: i32) -> (i32, i32) {
    %c0_i32 = arith.constant 0 : i32
    %c0_i32_0 = arith.constant 0 : i32
    %c0_i32_1 = arith.constant 0 : i32
    return %c0_i32, %c0_i32_0 : i32, i32
  }
  func.func @transform_5(%arg0: i32) -> (i32, i32) {
    %c0_i32 = arith.constant 0 : i32
    %c0_i32_0 = arith.constant 0 : i32
    %c0_i32_1 = arith.constant 0 : i32
    return %c0_i32, %c0_i32_0 : i32, i32
  }
  func.func @transform_6(%arg0: i32) -> (i32, i32) {
    %c0_i32 = arith.constant 0 : i32
    %c0_i32_0 = arith.constant 0 : i32
    %c0_i32_1 = arith.constant 0 : i32
    return %c0_i32, %c0_i32_0 : i32, i32
  }
  func.func @transform_7(%arg0: i32) -> (i32, i32) {
    %c0_i32 = arith.constant 0 : i32
    %c0_i32_0 = arith.constant 0 : i32
    %c0_i32_1 = arith.constant 0 : i32
    return %c0_i32, %c0_i32_0 : i32, i32
  }
  func.func @transform_8(%arg0: i32) -> (i32, i32) {
    %c0_i32 = arith.constant 0 : i32
    %c0_i32_0 = arith.constant 0 : i32
    %c0_i32_1 = arith.constant 0 : i32
    return %c0_i32, %c0_i32_0 : i32, i32
  }
  func.func @transform_9(%arg0: i32) -> (i32, i32) {
    %c0_i32 = arith.constant 0 : i32
    %c0_i32_0 = arith.constant 0 : i32
    %c0_i32_1 = arith.constant 0 : i32
    return %c0_i32, %c0_i32_0 : i32, i32
  }
  func.func @transform_10(%arg0: i32) -> (i32, i32) {
    %c0_i32 = arith.constant 0 : i32
    %c0_i32_0 = arith.constant 0 : i32
    %c0_i32_1 = arith.constant 0 : i32
    return %c0_i32, %c0_i32_0 : i32, i32
  }
  func.func @transform_11(%arg0: i32) -> (i32, i32) {
    %c0_i32 = arith.constant 0 : i32
    %c0_i32_0 = arith.constant 0 : i32
    %c0_i32_1 = arith.constant 0 : i32
    return %c0_i32, %c0_i32_0 : i32, i32
  }
  func.func @transform_12(%arg0: i32) -> (i32, i32) {
    %c0_i32 = arith.constant 0 : i32
    %c0_i32_0 = arith.constant 0 : i32
    %c0_i32_1 = arith.constant 0 : i32
    return %c0_i32, %c0_i32_0 : i32, i32
  }
  func.func @transform_13(%arg0: i32) -> (i32, i32) {
    %c0_i32 = arith.constant 0 : i32
    %c0_i32_0 = arith.constant 0 : i32
    %c0_i32_1 = arith.constant 0 : i32
    return %c0_i32, %c0_i32_0 : i32, i32
  }
  func.func @transform_14(%arg0: i32) -> (i32, i32, i32) {
    %c0_i32 = arith.constant 0 : i32
    %c0_i32_0 = arith.constant 0 : i32
    %c0_i32_1 = arith.constant 0 : i32
    return %arg0, %c0_i32, %c0_i32_0 : i32, i32, i32
  }
}

</mosaic_0001>

<bundles_post_ra>
// kernel: _lambda_.1
= control target key start
LH: loop header
LB: loop body
LE: loop exit
PB: predicated region body
PF: predicated region fallthrough
CT: control target
= control target key end

     0   :  { %19 = vsyncpa [#allocation4], 0  ;;  %s2249_s0 = inlined_call_operand.vmem [shape: f32[1,16,128], index: 0, kind: input, shape index: {}]   ;;  %s2250_s1 = inlined_call_operand.vmem [shape: f32[1,128], index: 1, kind: input, shape index: {}]   ;;  %s2251_s2 = inlined_call_operand.vmem [shape: f32[1,128], index: 2, kind: input, shape index: {}]   ;;  %s2252_s3 = inlined_call_operand.vmem [shape: f32[1,128], index: 3, kind: input, shape index: {}]   ;;  %s2253_s4 = inlined_call_operand.vmem [shape: f32[1,128], index: 4, kind: input, shape index: {}]   ;;  %s2254_s5 = inlined_call_operand.hbm [shape: bf16[384,128], index: 5, kind: input, shape index: {}]   ;;  %s2255_s6 = inlined_call_operand.hbm [shape: bf16[384,128], index: 6, kind: input, shape index: {}]   ;;  %s2256_s7 = inlined_call_operand.hbm [shape: bf16[128,128], index: 7, kind: input, shape index: {}]   ;;  %s2257_s8 = inlined_call_operand.vmem [shape: f32[1,128], index: 8, kind: input, shape index: {}]   ;;  %s2258_s9 = inlined_call_operand.vmem [shape: f32[1,128], index: 9, kind: input, shape index: {}]   ;;  %s2259_s10 = inlined_call_operand.vmem [shape: f32[1,128], index: 10, kind: input, shape index: {}]   ;;  %s2260_s11 = inlined_call_operand.vmem [shape: f32[1,128], index: 11, kind: input, shape index: {}]   ;;  %s2261_s12 = inlined_call_operand.vmem [shape: bf16[384,128], index: 12, kind: input, shape index: {}]   ;;  %s2262_s13 = inlined_call_operand.vmem [shape: bf16[384,128], index: 13, kind: input, shape index: {}]   ;;  %s2263_s14 = inlined_call_operand.vmem [shape: f32[1,8,128], index: 14, kind: output, shape index: {}]  }
   0x1   :  { %20 = vsyncpa [#allocation6], 0  ;;  %s1920_s29 = smov [#allocation5]   ;;  %s1921_s15 = smov [#allocation3]  }
   0x2   :  { %s48_s30 = sshll.u32 %s1920_s29, 4  ;;  %s36_s16 = sshll.u32 %s1921_s15, 4  ;;  %s49_s30 = int_to_ptr.vmem [resolvable:$true] %s48_s30  ;;  %s37_s16 = int_to_ptr.vmem [resolvable:$true] %s36_s16 }
   0x3   :  { %s1864_s17 = scalar_lea.vmem %s49_s30, 3072  ;;  %p1869_p1 = scmp.lt.s32.totalorder %s49_s30, %s49_s30 }
   0x4   :  { %p1865_p0 = scmp.ne.s32.totalorder %s49_s30, %s1864_s17  ;;  %p1870_p2 = scmp.lt.s32.totalorder %s1864_s17, %s1864_s17 }
   0x6   :  { %p1871_p3 = por %p1870_p2, %p1869_p1 }
   0x8   :  { %p1872_p4 = pnand %p1871_p3, %p1865_p0 }
   0xa   :  { %1875 = shalt.err (!%p1872_p4)
}
   0xb   :  { %s1922_s18 = smov 64   ;;  %s1923_s19 = smov 4  }
   0xc   :  { %54 = dma.hbm_to_vmem [thread:$0]  %s2255_s6, 3072, %s49_s30, [#allocation6], %s1922_s18, %s1922_s18, %s1923_s19  }
   0xd   :  { %s1884_s22 = scalar_lea.vmem %s37_s16, 3072  ;;  %p1889_p6 = scmp.lt.s32.totalorder %s37_s16, %s37_s16 }
   0xe   :  { %p1885_p5 = scmp.ne.s32.totalorder %s37_s16, %s1884_s22  ;;  %p1890_p7 = scmp.lt.s32.totalorder %s1884_s22, %s1884_s22 }
  0x10   :  { %p1891_p8 = por %p1890_p7, %p1889_p6 }
  0x12   :  { %p1892_p9 = pnand %p1891_p8, %p1885_p5 }
  0x14   :  { %1895 = shalt.err (!%p1892_p9)
}
  0x15   :  { %42 = dma.hbm_to_vmem [thread:$0]  %s2254_s5, 3072, %s37_s16, [#allocation4], %s1922_s18, %s1922_s18, %s1923_s19  }
  0x16   :  { %s1924_s25 = smov [#allocation7]  }
  0x17   :  { %s60_s26 = sshll.u32 %s1924_s25, 4  ;;  %s61_s26 = int_to_ptr.vmem [resolvable:$true] %s60_s26 }
  0x18   :  { %s1904_s27 = scalar_lea.vmem %s61_s26, 1024  ;;  %p1909_p11 = scmp.lt.s32.totalorder %s61_s26, %s61_s26 }
  0x19   :  { %p1905_p10 = scmp.ne.s32.totalorder %s61_s26, %s1904_s27  ;;  %p1910_p12 = scmp.lt.s32.totalorder %s1904_s27, %s1904_s27 }
  0x1b   :  { %p1911_p13 = por %p1910_p12, %p1909_p11 }
  0x1d   :  { %p1912_p0 = pnand %p1911_p13, %p1905_p10 }
  0x1f   :  { %1915 = shalt.err (!%p1912_p0)
}
  0x20   :  { %66 = dma.hbm_to_vmem [thread:$0]  %s2256_s7, 1024, %s61_s26, [#allocation6], %s1922_s18, %s1922_s18, %s1923_s19  }
  0x21   :  { %1916 = dma.done.wait [#allocation4], 3072  }
  0x22   :  { %1917 = vsyncadd [#allocation4], 4294964224 }
  0x23   :  { %1918 = dma.done.wait [#allocation6], 4096  }
  0x24   :  { %1919 = vsyncadd [#allocation6], 4294963200  ;;  %v1925_v0 = vmov 0.0   ;;  %vm1926_vm0 = vmmov 0   ;;  %v1752_v1 = vld [vmem:[#allocation3 + $0x78] sm:$0xff]   ;;  %v1755_v4 = vld [vmem:[#allocation3 + $0x70] sm:$0xff]  }
  0x25   :  { %111 = vst [vmem:[#allocation2] sm:$0x1] %v1925_v0  ;;  %1645 = vmatprep.subr.bf16.mxu1 %v1925_v0  ;;  %1661 = vmatprep.mubr.msk.bf16.mxu1 %vm1926_vm0, %v1925_v0  ;;  %v1753_v2 = vld [vmem:[#allocation3 + $0xb8] sm:$0xff]   ;;  %v1756_v5 = vld [vmem:[#allocation3 + $0xb0] sm:$0xff]   ;;  %v1758_v7 = vld [vmem:[#allocation3 + $0x68] sm:$0xff]  }
  0x26   :  { %1512 = vmatprep.subr.bf16.mxu0 %v1752_v1  ;;  %v1754_v3 = vld [vmem:[#allocation3 + $0x38] sm:$0xff]   ;;  %1646 = vmatpush3.bf16.msra.mxu1 %v1753_v2  ;;  %v1757_v6 = vld [vmem:[#allocation3 + $0x30] sm:$0xff]   ;;  %v1759_v8 = vld [vmem:[#allocation3 + $0xa8] sm:$0xff]  }
  0x27   :  { %1513 = vmatpush3.bf16.msra.mxu0 %v1754_v3  ;;  %1647 = vmatprep.subr.bf16.mxu1 %v1925_v0  ;;  %v1760_v9 = vld [vmem:[#allocation3 + $0x28] sm:$0xff]   ;;  %v1761_v10 = vld [vmem:[#allocation3 + $0x60] sm:$0xff]   ;;  %v1764_v13 = vld [vmem:[#allocation3 + $0x58] sm:$0xff]  }
  0x28   :  { %1514 = vmatprep.subr.bf16.mxu0 %v1755_v4  ;;  %v1762_v11 = vld [vmem:[#allocation3 + $0xa0] sm:$0xff]   ;;  %v1765_v14 = vld [vmem:[#allocation3 + $0x98] sm:$0xff]   ;;  %v1767_v16 = vld [vmem:[#allocation3 + $0x50] sm:$0xff]  }
  0x29   :  { %v1763_v12 = vld [vmem:[#allocation3 + $0x20] sm:$0xff]   ;;  %v1766_v15 = vld [vmem:[#allocation3 + $0x18] sm:$0xff]   ;;  %v1768_v17 = vld [vmem:[#allocation3 + $0x90] sm:$0xff]  }
  0x2a   :  { %1648 = vmatpush3.bf16.msra.mxu1 %v1756_v5  ;;  %v1769_v18 = vld [vmem:[#allocation3 + $0x10] sm:$0xff]   ;;  %v1770_v19 = vld [vmem:[#allocation3 + $0x48] sm:$0xff]   ;;  %v1773_v22 = vld [vmem:[#allocation3 + $0x40] sm:$0xff]  }
  0x2b   :  { %1515 = vmatpush3.bf16.msra.mxu0 %v1757_v6  ;;  %1649 = vmatprep.subr.bf16.mxu1 %v1925_v0  ;;  %v1771_v20 = vld [vmem:[#allocation3 + $0x88] sm:$0xff]   ;;  %v90_v24 = vld [vmem:[%s2249_s0 + $0x8] sm:$0xff]  ;;  %v1774_v29 = vld [vmem:[#allocation3 + $0x80] sm:$0xff]  }
  0x2c   :  { %1516 = vmatprep.subr.bf16.mxu0 %v1758_v7  ;;  %v1772_v21 = vld [vmem:[#allocation3 + $0x8] sm:$0xff]   ;;  %v1775_v32 = vld [vmem:[#allocation3] sm:$0xff]   ;;  %v1784_v35 = vld [vmem:[#allocation5 + $0x78] sm:$0xff]  }
  0x2d   :  { %v89_v23 = vld [vmem:[%s2249_s0] sm:$0xff]  ;;  %v1776_v36 = vld [vmem:[#allocation7 + $0x38] sm:$0xff]   ;;  %v1787_v44 = vld [vmem:[#allocation5 + $0x70] sm:$0xff]  }
  0x2e   :  { %1650 = vmatpush3.bf16.msra.mxu1 %v1759_v8  ;;  %v1400_v25 = vld [vmem:[%s2250_s1] ss:$0 sm:$0xff]  ;;  %v1786_v37 = vld [vmem:[#allocation5 + $0x38] sm:$0xff]   ;;  %v1789_v45 = vld [vmem:[#allocation5 + $0x30] sm:$0xff]  }
  0x2f   :  { %1517 = vmatpush3.bf16.msra.mxu0 %v1760_v9  ;;  %1651 = vmatprep.subr.bf16.mxu1 %v1925_v0  ;;  %v98_v26 = vmul.f32 %v1400_v25, %v89_v23  ;;  %v99_v27 = vmul.f32 %v1400_v25, %v90_v24  ;;  %v1401_v28 = vld [vmem:[%s2251_s2] ss:$0 sm:$0xff]  ;;  %v1777_v46 = vld [vmem:[#allocation7 + $0x30] sm:$0xff]   ;;  %v1779_v48 = vld [vmem:[#allocation7 + $0x20] sm:$0xff]  }
  0x30   :  { %1518 = vmatprep.subr.bf16.mxu0 %v1761_v10  ;;  %v1778_v47 = vld [vmem:[#allocation7 + $0x28] sm:$0xff]   ;;  %v1780_v49 = vld [vmem:[#allocation7 + $0x18] sm:$0xff]   ;;  %v1781_v50 = vld [vmem:[#allocation7 + $0x10] sm:$0xff]  }
  0x31   :  { %v107_v30 = vadd.f32 %v1401_v28, %v98_v26  ;;  %v108_v31 = vadd.f32 %v1401_v28, %v99_v27  ;;  %v1782_v51 = vld [vmem:[#allocation7 + $0x8] sm:$0xff]   ;;  %v1783_v52 = vld [vmem:[#allocation7] sm:$0xff]   ;;  %v1785_v53 = vld [vmem:[#allocation5 + $0xb8] sm:$0xff]  }
  0x32   :  { %1652 = vmatpush3.bf16.msra.mxu1 %v1762_v11  ;;  %v1788_v54 = vld [vmem:[#allocation5 + $0xb0] sm:$0xff]   ;;  %v1790_v55 = vld [vmem:[#allocation5 + $0x68] sm:$0xff]   ;;  %v1793_v58 = vld [vmem:[#allocation5 + $0x60] sm:$0xff]  }
  0x33   :  { %1519 = vmatpush3.bf16.msra.mxu0 %v1763_v12  ;;  %1653 = vmatprep.subr.bf16.mxu1 %v1925_v0  ;;  %v109_v33 = vmax.f32 %v107_v30, 0.0  ;;  %v110_v34 = vmax.f32 %v108_v31, 0.0  ;;  %v1791_v56 = vld [vmem:[#allocation5 + $0xa8] sm:$0xff]   ;;  %v1794_v59 = vld [vmem:[#allocation5 + $0xa0] sm:$0xff]   ;;  %v1796_v61 = vld [vmem:[#allocation5 + $0x58] sm:$0xff]  }
  0x34   :  { %1520 = vmatprep.subr.bf16.mxu0 %v1764_v13  ;;  %v1792_v57 = vld [vmem:[#allocation5 + $0x28] sm:$0xff]   ;;  %v1795_v60 = vld [vmem:[#allocation5 + $0x20] sm:$0xff]   ;;  %v1797_v62 = vld [vmem:[#allocation5 + $0x98] sm:$0xff]  }
  0x35   :  { %112 = vst [vmem:[#allocation2 + $0x1] sm:$0xff] %v109_v33  ;;  %113 = vst [vmem:[#allocation2 + $0x9] sm:$0xff] %v110_v34  ;;  %v1798_v63 = vld [vmem:[#allocation5 + $0x18] sm:$0xff]   ;;  %v1799_v1 = vld [vmem:[#allocation5 + $0x50] sm:$0xff]  }
  0x36   :  { %1654 = vmatpush3.bf16.msra.mxu1 %v1765_v14  ;;  %v1800_v2 = vld [vmem:[#allocation5 + $0x90] sm:$0xff]   ;;  %v1802_v4 = vld [vmem:[#allocation5 + $0x48] sm:$0xff]   ;;  %v1805_v7 = vld [vmem:[#allocation5 + $0x40] sm:$0xff]  }
  0x37   :  { %1521 = vmatpush3.bf16.msra.mxu0 %v1766_v15  ;;  %1655 = vmatprep.subr.bf16.mxu1 %v1925_v0  ;;  %v1801_v3 = vld [vmem:[#allocation5 + $0x10] sm:$0xff]   ;;  %v1803_v5 = vld [vmem:[#allocation5 + $0x88] sm:$0xff]   ;;  %v1806_v8 = vld [vmem:[#allocation5 + $0x80] sm:$0xff]  }
  0x38   :  { %1522 = vmatprep.subr.bf16.mxu0 %v1767_v16  ;;  %v1804_v6 = vld [vmem:[#allocation5 + $0x8] sm:$0xff]   ;;  %v1807_v9 = vld [vmem:[#allocation5] sm:$0xff]   ;;  %v1811_v33 = vld [vmem:[%s2261_s12 + $0x70] sm:$0xff]  }
  0x39   :  { %v1808_v10 = vld [vmem:[%s2261_s12 + $0x78] sm:$0xff]   ;;  %v1812_v34 = vld [vmem:[%s2261_s12 + $0xb0] sm:$0xff]  }
  0x3a   :  { %1656 = vmatpush3.bf16.msra.mxu1 %v1768_v17  ;;  %v1426_v17 = vld [vmem:[%s2252_s3] ss:$0 sm:$0xff]  ;;  %v1809_v27 = vld [vmem:[%s2261_s12 + $0xb8] sm:$0xff]  }
  0x3b   :  { %1523 = vmatpush3.bf16.msra.mxu0 %v1769_v18  ;;  %1657 = vmatprep.subr.bf16.mxu1 %v1925_v0  ;;  %v1810_v30 = vld [vmem:[%s2261_s12 + $0x38] sm:$0xff]  }
  0x3c   :  { %1524 = vmatprep.subr.bf16.mxu0 %v1770_v19  ;;  %v117_v38 = vld [vmem:[#allocation2 + $0x1] ss:$2 sm:$0xff]  ;;  %v119_v39 = vld [vmem:[#allocation2 + $0x2] ss:$2 sm:$0xff] }
  0x3d   :  { %v115_v40 = vld [vmem:[#allocation2] ss:$2 sm:$0xff]  ;;  %v121_v41 = vpack.c.bf16 %v117_v38, %v117_v38  ;;  %518 = vst [vmem:[#allocation2 + $0x9] sm:$0x1] %v1925_v0  ;;  %v122_v42 = vpack.c.bf16 %v119_v39, %v119_v39  ;;  %v1813_v39 = vld [vmem:[%s2261_s12 + $0x30] sm:$0xff]  }
  0x3e   :  { %1658 = vmatpush3.bf16.msra.mxu1 %v1771_v20  ;;  %v120_v43 = vpack.c.bf16 %v115_v40, %v115_v40  ;;  %516 = vst [vmem:[#allocation2] sm:$0x1] %v1925_v0  ;;  %v1814_v40 = vld [vmem:[%s2261_s12 + $0x68] sm:$0xff]  }
  0x3f   :  { %1525 = vmatpush3.bf16.msra.mxu0 %v1772_v21  ;;  %1659 = vmatprep.subr.bf16.mxu1 %v1925_v0  ;;  %v1427_v21 = vld [vmem:[%s2253_s4] ss:$0 sm:$0xff] }
  0x40   :  { %1526 = vmatprep.subr.bf16.mxu0 %v1773_v22  ;;  %347 = vmatprep.mubr.bf16.mxu0 %v121_v41 }
  0x42   :  { %1660 = vmatpush3.bf16.msra.mxu1 %v1774_v29 }
  0x43   :  { %1527 = vmatpush3.bf16.msra.mxu0 %v1775_v32  ;;  %1552 = vmatprep.subr.bf16.mxu1 %v1784_v35 }
  0x44   :  { %1665 = vmatprep.subr.bf16.mxu0 %v1925_v0 }
  0x45   :  { %1662 = vmatmul.mubr.bf16.vlgmr.msra.gmra.mxu1 %v122_v42  ;;  %v1816_v42 = vld [vmem:[%s2261_s12 + $0x28] sm:$0xff]  }
  0x46   :  { %348 = vmatmul.mubr.bf16.vlgmr.msra.gmra.mxu0 %v120_v43  ;;  %1553 = vmatpush3.bf16.msra.mxu1 %v1786_v37  ;;  %v1817_v43 = vld [vmem:[%s2261_s12 + $0x60] sm:$0xff]  }
  0x47   :  { %1666 = vmatpush3.bf16.msra.mxu0 %v1776_v36  ;;  %1681 = vmatprep.mubr.msk.bf16.mxu0 %vm1926_vm0, %v1925_v0 }
  0x48   :  { %1667 = vmatprep.subr.bf16.mxu0 %v1925_v0  ;;  %1554 = vmatprep.subr.bf16.mxu1 %v1787_v44  ;;  %v1818_v44 = vld [vmem:[%s2261_s12 + $0xa0] sm:$0xff]  }
  0x4a   :  { %1555 = vmatpush3.bf16.msra.mxu1 %v1789_v45  ;;  %v1819_v45 = vld [vmem:[%s2261_s12 + $0x20] sm:$0xff]  }
  0x4b   :  { %1668 = vmatpush3.bf16.msra.mxu0 %v1777_v46  ;;  %1556 = vmatprep.subr.bf16.mxu1 %v1790_v55  ;;  %v1820_v46 = vld [vmem:[%s2261_s12 + $0x58] sm:$0xff]   ;;  %v1829_v55 = vld [vmem:[%s2261_s12 + $0x40] sm:$0xff]  }
  0x4c   :  { %1669 = vmatprep.subr.bf16.mxu0 %v1925_v0 }
  0x4e   :  { %1557 = vmatpush3.bf16.msra.mxu1 %v1792_v57  ;;  %v1831_v57 = vld [vmem:[%s2261_s12] sm:$0xff]  }
  0x4f   :  { %1670 = vmatpush3.bf16.msra.mxu0 %v1778_v47  ;;  %1558 = vmatprep.subr.bf16.mxu1 %v1793_v58  ;;  %v1821_v47 = vld [vmem:[%s2261_s12 + $0x98] sm:$0xff]  }
  0x50   :  { %1671 = vmatprep.subr.bf16.mxu0 %v1925_v0  ;;  %v1832_v58 = vld [vmem:[%s2262_s13 + $0x78] sm:$0xff]  }
  0x52   :  { %1559 = vmatpush3.bf16.msra.mxu1 %v1795_v60 }
  0x53   :  { %1672 = vmatpush3.bf16.msra.mxu0 %v1779_v48  ;;  %1560 = vmatprep.subr.bf16.mxu1 %v1796_v61  ;;  %v1822_v48 = vld [vmem:[%s2261_s12 + $0x18] sm:$0xff]  }
  0x54   :  { %1673 = vmatprep.subr.bf16.mxu0 %v1925_v0 }
  0x56   :  { %1561 = vmatpush3.bf16.msra.mxu1 %v1798_v63 }
  0x57   :  { %1674 = vmatpush3.bf16.msra.mxu0 %v1780_v49  ;;  %1562 = vmatprep.subr.bf16.mxu1 %v1799_v1  ;;  %v1823_v49 = vld [vmem:[%s2261_s12 + $0x50] sm:$0xff]  }
  0x58   :  { %1675 = vmatprep.subr.bf16.mxu0 %v1925_v0 }
  0x5a   :  { %1563 = vmatpush3.bf16.msra.mxu1 %v1801_v3 }
  0x5b   :  { %1676 = vmatpush3.bf16.msra.mxu0 %v1781_v50  ;;  %1564 = vmatprep.subr.bf16.mxu1 %v1802_v4  ;;  %v1824_v50 = vld [vmem:[%s2261_s12 + $0x90] sm:$0xff]   ;;  %v1460_v4 = vld [vmem:[%s2257_s8] ss:$0 sm:$0xff] }
  0x5c   :  { %1677 = vmatprep.subr.bf16.mxu0 %v1925_v0 }
  0x5e   :  { %1565 = vmatpush3.bf16.msra.mxu1 %v1804_v6 }
  0x5f   :  { %1678 = vmatpush3.bf16.msra.mxu0 %v1782_v51  ;;  %1566 = vmatprep.subr.bf16.mxu1 %v1805_v7  ;;  %v1825_v51 = vld [vmem:[%s2261_s12 + $0x10] sm:$0xff]  }
  0x60   :  { %1679 = vmatprep.subr.bf16.mxu0 %v1925_v0 }
  0x62   :  { %1567 = vmatpush3.bf16.msra.mxu1 %v1807_v9 }
  0x63   :  { %1680 = vmatpush3.bf16.msra.mxu0 %v1783_v52  ;;  %1583 = vmatprep.subr.bf16.mxu1 %v1808_v10  ;;  %v1826_v52 = vld [vmem:[%s2261_s12 + $0x48] sm:$0xff]  }
  0x64   :  { %1685 = vmatprep.subr.bf16.mxu0 %v1925_v0 }
  0x66   :  { %1682 = vmatmul.mubr.bf16.vlgmr.msra.gmra.mxu0 %v121_v41  ;;  %v1815_v41 = vld [vmem:[%s2261_s12 + $0xa8] sm:$0xff]  }
  0x67   :  { %1686 = vmatpush3.bf16.msra.mxu0 %v1785_v53  ;;  %1701 = vmatprep.mubr.msk.bf16.mxu0 %vm1926_vm0, %v1925_v0  ;;  %v1827_v53 = vld [vmem:[%s2261_s12 + $0x88] sm:$0xff]  }
  0x68   :  { %1687 = vmatprep.subr.bf16.mxu0 %v1925_v0 }
  0x6b   :  { %1688 = vmatpush3.bf16.msra.mxu0 %v1788_v54  ;;  %v1828_v54 = vld [vmem:[%s2261_s12 + $0x8] sm:$0xff]  }
  0x6c   :  { %1689 = vmatprep.subr.bf16.mxu0 %v1925_v0 }
  0x6f   :  { %1690 = vmatpush3.bf16.msra.mxu0 %v1791_v56  ;;  %v1830_v56 = vld [vmem:[%s2261_s12 + $0x80] sm:$0xff]  }
  0x70   :  { %1691 = vmatprep.subr.bf16.mxu0 %v1925_v0 }
  0x73   :  { %1692 = vmatpush3.bf16.msra.mxu0 %v1794_v59 }
  0x74   :  { %1693 = vmatprep.subr.bf16.mxu0 %v1925_v0 }
  0x77   :  { %1694 = vmatpush3.bf16.msra.mxu0 %v1797_v62 }
  0x78   :  { %1695 = vmatprep.subr.bf16.mxu0 %v1925_v0 }
  0x7b   :  { %1696 = vmatpush3.bf16.msra.mxu0 %v1800_v2 }
  0x7c   :  { %1697 = vmatprep.subr.bf16.mxu0 %v1925_v0 }
  0x7f   :  { %1698 = vmatpush3.bf16.msra.mxu0 %v1803_v5 }
  0x80   :  { %1699 = vmatprep.subr.bf16.mxu0 %v1925_v0 }
  0x83   :  { %1700 = vmatpush3.bf16.msra.mxu0 %v1806_v8  ;;  %v1461_v8 = vld [vmem:[%s2258_s9] ss:$0 sm:$0xff] }
  0x84   :  { %1705 = vmatprep.subr.bf16.mxu0 %v1925_v0 }
 0x105   :  { %v389_v11 = vpop.f32.mrf.mxu1 }
 0x106   :  { %v1528_v12 = vpop.f32.mrf.mxu0 }
 0x107   :  { %v1663_v13 = vpop.f32.mrf.mxu1 }
 0x108   :  { %v1529_v14 = vpop.f32.mrf.mxu0  ;;  %v1833_v13 = vld [vmem:[%s2262_s13 + $0xb8] sm:$0xff]  }
 0x109   :  { %v1530_v15 = vadd.f32 %v1529_v14, %v1528_v12  ;;  %v392_v16 = vpop.f32.mrf.mxu1 }
 0x10a   :  { %v1531_v18 = vpop.f32.mrf.mxu0  ;;  %v1834_v16 = vld [vmem:[%s2262_s13 + $0x38] sm:$0xff]  }
 0x10b   :  { %v390_v19 = vadd.f32 %v1530_v15, %v389_v11  ;;  %v1664_v20 = vpop.f32.mrf.mxu1 }
 0x10c   :  { %v1532_v22 = vpop.f32.mrf.mxu0  ;;  %v1836_v20 = vld [vmem:[%s2262_s13 + $0xb0] sm:$0xff]  }
 0x10d   :  { %v402_v23 = vmul.f32 %v1426_v17, %v390_v19  ;;  %v1835_v19 = vld [vmem:[%s2262_s13 + $0x70] sm:$0xff]   ;;  %v1838_v22 = vld [vmem:[%s2262_s13 + $0x68] sm:$0xff]  }
 0x10f   :  { %v410_v24 = vadd.f32 %v1427_v21, %v402_v23  ;;  %v1837_v21 = vld [vmem:[%s2262_s13 + $0x30] sm:$0xff]   ;;  %v1839_v23 = vld [vmem:[%s2262_s13 + $0xa8] sm:$0xff]  }
 0x111   :  { %v411_v25 = vmax.f32 %v410_v24, 0.0  ;;  %v1840_v24 = vld [vmem:[%s2262_s13 + $0x28] sm:$0xff]  }
 0x113   :  { %517 = vst [vmem:[#allocation2 + $0x1] sm:$0xff] %v411_v25  ;;  %v523_v26 = vpack.c.bf16 %v411_v25, %v411_v25  ;;  %v1841_v25 = vld [vmem:[%s2262_s13 + $0x60] sm:$0xff]  }
 0x115   :  { %749 = vmatprep.mubr.bf16.mxu1 %v523_v26  ;;  %v1842_v26 = vld [vmem:[%s2262_s13 + $0xa0] sm:$0xff]  }
 0x11a   :  { %v521_v28 = vld [vmem:[#allocation2 + $0x2] sm:$0xff] }
 0x11b   :  { %v519_v29 = vld [vmem:[#allocation2] sm:$0xff]  ;;  %v524_v31 = vpack.c.bf16 %v521_v28, %v521_v28  ;;  %816 = vst [vmem:[#allocation2 + $0x9] sm:$0x1] %v1925_v0  ;;  %v1844_v28 = vld [vmem:[%s2262_s13 + $0x58] sm:$0xff]  }
 0x11c   :  { %v522_v32 = vpack.c.bf16 %v519_v29, %v519_v29  ;;  %814 = vst [vmem:[#allocation2] sm:$0x1] %v1925_v0  ;;  %v1845_v29 = vld [vmem:[%s2262_s13 + $0x98] sm:$0xff]  }
 0x11d   :  { %1702 = vmatmul.mubr.bf16.vlgmr.msra.gmra.mxu0 %v524_v31  ;;  %v1847_v31 = vld [vmem:[%s2262_s13 + $0x50] sm:$0xff]  }
 0x11e   :  { %750 = vmatmul.mubr.bf16.vlgmr.msra.gmra.mxu1 %v522_v32  ;;  %1706 = vmatpush3.bf16.msra.mxu0 %v1809_v27  ;;  %v1843_v27 = vld [vmem:[%s2262_s13 + $0x20] sm:$0xff]   ;;  %v1848_v32 = vld [vmem:[%s2262_s13 + $0x90] sm:$0xff]  }
 0x11f   :  { %1584 = vmatpush3.bf16.msra.mxu1 %v1810_v30  ;;  %1707 = vmatprep.subr.bf16.mxu0 %v1925_v0  ;;  %v1846_v30 = vld [vmem:[%s2262_s13 + $0x18] sm:$0xff]  }
 0x120   :  { %1585 = vmatprep.subr.bf16.mxu1 %v1811_v33  ;;  %1721 = vmatprep.mubr.msk.bf16.mxu0 %vm1926_vm0, %v1925_v0  ;;  %v1849_v33 = vld [vmem:[%s2262_s13 + $0x10] sm:$0xff]  }
 0x122   :  { %1708 = vmatpush3.bf16.msra.mxu0 %v1812_v34  ;;  %v1850_v34 = vld [vmem:[%s2262_s13 + $0x48] sm:$0xff]  }
 0x123   :  { %1709 = vmatprep.subr.bf16.mxu0 %v1925_v0  ;;  %1586 = vmatpush3.bf16.msra.mxu1 %v1813_v39  ;;  %v1855_v39 = vld [vmem:[%s2262_s13] sm:$0xff]  }
 0x124   :  { %1587 = vmatprep.subr.bf16.mxu1 %v1814_v40 }
 0x126   :  { %v510_v35 = vpop.f32.mrf.mxu0  ;;  %1710 = vmatpush3.bf16.msra.mxu0 %v1815_v41 }
 0x127   :  { %1588 = vmatpush3.bf16.msra.mxu1 %v1816_v42  ;;  %1711 = vmatprep.subr.bf16.mxu0 %v1925_v0 }
 0x128   :  { %v1683_v36 = vpop.f32.mrf.mxu0  ;;  %1589 = vmatprep.subr.bf16.mxu1 %v1817_v43 }
 0x129   :  { %v1852_v36 = vld [vmem:[%s2262_s13 + $0x8] sm:$0xff]  }
 0x12a   :  { %v513_v37 = vpop.f32.mrf.mxu0  ;;  %1712 = vmatpush3.bf16.msra.mxu0 %v1818_v44 }
 0x12b   :  { %1590 = vmatpush3.bf16.msra.mxu1 %v1819_v45  ;;  %1713 = vmatprep.subr.bf16.mxu0 %v1925_v0  ;;  %v1853_v37 = vld [vmem:[%s2262_s13 + $0x40] sm:$0xff]  }
 0x12c   :  { %v1684_v38 = vpop.f32.mrf.mxu0  ;;  %1591 = vmatprep.subr.bf16.mxu1 %v1820_v46  ;;  %v1486_v45 = vld [vmem:[%s2259_s10] ss:$0 sm:$0xff] }
 0x12d   :  { %v1854_v38 = vld [vmem:[%s2262_s13 + $0x80] sm:$0xff]  }
 0x12e   :  { %1714 = vmatpush3.bf16.msra.mxu0 %v1821_v47 }
 0x12f   :  { %1592 = vmatpush3.bf16.msra.mxu1 %v1822_v48  ;;  %1715 = vmatprep.subr.bf16.mxu0 %v1925_v0 }
 0x130   :  { %1593 = vmatprep.subr.bf16.mxu1 %v1823_v49  ;;  %v1487_v49 = vld [vmem:[%s2260_s11] ss:$0 sm:$0xff] }
 0x132   :  { %1716 = vmatpush3.bf16.msra.mxu0 %v1824_v50 }
 0x133   :  { %1594 = vmatpush3.bf16.msra.mxu1 %v1825_v51  ;;  %1717 = vmatprep.subr.bf16.mxu0 %v1925_v0 }
 0x134   :  { %1595 = vmatprep.subr.bf16.mxu1 %v1826_v52 }
 0x136   :  { %1718 = vmatpush3.bf16.msra.mxu0 %v1827_v53 }
 0x137   :  { %1596 = vmatpush3.bf16.msra.mxu1 %v1828_v54  ;;  %1719 = vmatprep.subr.bf16.mxu0 %v1925_v0 }
 0x138   :  { %1597 = vmatprep.subr.bf16.mxu1 %v1829_v55 }
 0x13a   :  { %1720 = vmatpush3.bf16.msra.mxu0 %v1830_v56 }
 0x13b   :  { %1598 = vmatpush3.bf16.msra.mxu1 %v1831_v57  ;;  %1725 = vmatprep.subr.bf16.mxu0 %v1925_v0 }
 0x13c   :  { %1614 = vmatprep.subr.bf16.mxu1 %v1832_v58 }
 0x1dd   :  { %v791_v59 = vpop.f32.mrf.mxu0 }
 0x1de   :  { %v1568_v60 = vpop.f32.mrf.mxu1 }
 0x1df   :  { %v1703_v61 = vpop.f32.mrf.mxu0 }
 0x1e0   :  { %v1569_v62 = vpop.f32.mrf.mxu1 }
 0x1e1   :  { %v1570_v63 = vadd.f32 %v1569_v62, %v1568_v60  ;;  %v794_v1 = vpop.f32.mrf.mxu0 }
 0x1e2   :  { %v1571_v2 = vpop.f32.mrf.mxu1 }
 0x1e3   :  { %v752_v3 = vadd.f32 %v1570_v63, %v510_v35  ;;  %v1704_v5 = vpop.f32.mrf.mxu0  ;;  %v1851_v35 = vld [vmem:[%s2262_s13 + $0x88] sm:$0xff]  }
 0x1e4   :  { %v1572_v6 = vpop.f32.mrf.mxu1 }
 0x1e5   :  { %v2153_v7 = vadd.f32 %v791_v59, %v752_v3 }
 0x1e7   :  { %v804_v9 = vmul.f32 %v1460_v4, %v2153_v7 }
 0x1e9   :  { %v812_v10 = vadd.f32 %v1461_v8, %v804_v9 }
 0x1eb   :  { %v813_v11 = vmax.f32 %v812_v10, 0.0 }
 0x1ed   :  { %815 = vst [vmem:[#allocation2 + $0x1] sm:$0xff] %v813_v11  ;;  %v821_v12 = vpack.c.bf16 %v813_v11, %v813_v11 }
 0x1ef   :  { %1047 = vmatprep.mubr.bf16.mxu1 %v821_v12 }
 0x1f4   :  { %v819_v14 = vld [vmem:[#allocation2 + $0x2] sm:$0xff] }
 0x1f5   :  { %v817_v15 = vld [vmem:[#allocation2] sm:$0xff]  ;;  %v822_v17 = vpack.c.bf16 %v819_v14, %v819_v14  ;;  %1114 = vst [vmem:[#allocation2 + $0x9] sm:$0x1] %v1925_v0 }
 0x1f6   :  { %v820_v18 = vpack.c.bf16 %v817_v15, %v817_v15  ;;  %1112 = vst [vmem:[#allocation2] sm:$0x1] %v1925_v0 }
 0x1f7   :  { %1722 = vmatmul.mubr.bf16.vlgmr.msra.gmra.mxu0 %v822_v17 }
 0x1f8   :  { %1048 = vmatmul.mubr.bf16.vlgmr.msra.gmra.mxu1 %v820_v18  ;;  %1726 = vmatpush3.bf16.msra.mxu0 %v1833_v13 }
 0x1f9   :  { %1615 = vmatpush3.bf16.msra.mxu1 %v1834_v16  ;;  %1727 = vmatprep.subr.bf16.mxu0 %v1925_v0 }
 0x1fa   :  { %1616 = vmatprep.subr.bf16.mxu1 %v1835_v19  ;;  %1741 = vmatprep.mubr.msk.bf16.mxu0 %vm1926_vm0, %v1925_v0 }
 0x1fc   :  { %1728 = vmatpush3.bf16.msra.mxu0 %v1836_v20 }
 0x1fd   :  { %1617 = vmatpush3.bf16.msra.mxu1 %v1837_v21  ;;  %1729 = vmatprep.subr.bf16.mxu0 %v1925_v0 }
 0x1fe   :  { %1618 = vmatprep.subr.bf16.mxu1 %v1838_v22 }
 0x200   :  { %1730 = vmatpush3.bf16.msra.mxu0 %v1839_v23 }
 0x201   :  { %1619 = vmatpush3.bf16.msra.mxu1 %v1840_v24  ;;  %1731 = vmatprep.subr.bf16.mxu0 %v1925_v0 }
 0x202   :  { %1620 = vmatprep.subr.bf16.mxu1 %v1841_v25 }
 0x204   :  { %1732 = vmatpush3.bf16.msra.mxu0 %v1842_v26 }
 0x205   :  { %1621 = vmatpush3.bf16.msra.mxu1 %v1843_v27  ;;  %1733 = vmatprep.subr.bf16.mxu0 %v1925_v0 }
 0x206   :  { %1622 = vmatprep.subr.bf16.mxu1 %v1844_v28 }
 0x208   :  { %1734 = vmatpush3.bf16.msra.mxu0 %v1845_v29 }
 0x209   :  { %1623 = vmatpush3.bf16.msra.mxu1 %v1846_v30  ;;  %1735 = vmatprep.subr.bf16.mxu0 %v1925_v0 }
 0x20a   :  { %1624 = vmatprep.subr.bf16.mxu1 %v1847_v31 }
 0x20c   :  { %1736 = vmatpush3.bf16.msra.mxu0 %v1848_v32 }
 0x20d   :  { %1625 = vmatpush3.bf16.msra.mxu1 %v1849_v33  ;;  %1737 = vmatprep.subr.bf16.mxu0 %v1925_v0 }
 0x20e   :  { %1626 = vmatprep.subr.bf16.mxu1 %v1850_v34 }
 0x210   :  { %1738 = vmatpush3.bf16.msra.mxu0 %v1851_v35 }
 0x211   :  { %1627 = vmatpush3.bf16.msra.mxu1 %v1852_v36  ;;  %1739 = vmatprep.subr.bf16.mxu0 %v1925_v0 }
 0x212   :  { %1628 = vmatprep.subr.bf16.mxu1 %v1853_v37 }
 0x214   :  { %1740 = vmatpush3.bf16.msra.mxu0 %v1854_v38 }
 0x215   :  { %1629 = vmatpush3.bf16.msra.mxu1 %v1855_v39 }
 0x2b7   :  { %v1089_v40 = vpop.f32.mrf.mxu0 }
 0x2b8   :  { %v1599_v41 = vpop.f32.mrf.mxu1 }
 0x2b9   :  { %v1723_v42 = vpop.f32.mrf.mxu0 }
 0x2ba   :  { %v1600_v43 = vpop.f32.mrf.mxu1 }
 0x2bb   :  { %v1601_v44 = vadd.f32 %v1600_v43, %v1599_v41  ;;  %v1092_v46 = vpop.f32.mrf.mxu0 }
 0x2bc   :  { %v1602_v47 = vpop.f32.mrf.mxu1 }
 0x2bd   :  { %v1090_v48 = vadd.f32 %v1601_v44, %v1089_v40  ;;  %v1724_v0 = vpop.f32.mrf.mxu0 }
 0x2be   :  { %v1603_v50 = vpop.f32.mrf.mxu1 }
 0x2bf   :  { %v1102_v51 = vmul.f32 %v1486_v45, %v1090_v48 }
 0x2c1   :  { %v1110_v52 = vadd.f32 %v1487_v49, %v1102_v51 }
 0x2c3   :  { %v1111_v53 = vmax.f32 %v1110_v52, 0.0 }
 0x2c5   :  { %1113 = vst [vmem:[#allocation2 + $0x1] sm:$0xff] %v1111_v53  ;;  %v1119_v54 = vpack.c.bf16 %v1111_v53, %v1111_v53 }
 0x2c7   :  { %1345 = vmatprep.mubr.bf16.mxu1 %v1119_v54 }
 0x2cc   :  { %v1117_v55 = vld [vmem:[#allocation2 + $0x2] sm:$0xff] }
 0x2cd   :  { %v1115_v56 = vld [vmem:[#allocation2] sm:$0xff]  ;;  %v1120_v57 = vpack.c.bf16 %v1117_v55, %v1117_v55 }
 0x2ce   :  { %v1118_v58 = vpack.c.bf16 %v1115_v56, %v1115_v56 }
 0x2cf   :  { %1742 = vmatmul.mubr.bf16.vlgmr.msra.gmra.mxu0 %v1120_v57 }
 0x2d0   :  { %1346 = vmatmul.mubr.bf16.vlgmr.msra.gmra.mxu1 %v1118_v58 }
 0x38f   :  { %v1387_v59 = vpop.f32.mrf.mxu0 }
 0x390   :  { %v1630_v60 = vpop.f32.mrf.mxu1 }
 0x391   :  { %v1743_v61 = vpop.f32.mrf.mxu0 }
 0x392   :  { %v1631_v62 = vpop.f32.mrf.mxu1 }
 0x393   :  { %v1632_v63 = vadd.f32 %v1631_v62, %v1630_v60  ;;  %v1390_v1 = vpop.f32.mrf.mxu0 }
 0x394   :  { %v1633_v2 = vpop.f32.mrf.mxu1 }
 0x395   :  { %v1348_v3 = vadd.f32 %v1632_v63, %v2153_v7  ;;  %v1744_v4 = vpop.f32.mrf.mxu0 }
 0x396   :  { %v1634_v5 = vpop.f32.mrf.mxu1 }
 0x397   :  { %v1388_v6 = vadd.f32 %v1387_v59, %v1348_v3 }
 0x399   :  { %1393 = vst [vmem:[%s2263_s14] sm:$0xff] %v1388_v6 }
 0x39a   :  { %1398 = vsyncpa [#allocation4], 1 }
 0x39b   :  { %1399 = vsyncpa [#allocation6], 1 }

</bundles_post_ra>
